<compile_context>
chip_gen: v5e
topology: v5e:2x2
jax: 0.10.0
libtpu: 0.0.40
codegen_flags: <defaults>
</compile_context>

<pallas_src>
import jax
import jax.numpy as jnp
from jax import lax
from jax.experimental import pallas as pl
from jax.experimental.pallas import tpu as pltpu

# ---- model hyper-parameters (derived from the PyTorch module) -------------
VOCAB = sorted(set("hello world"))          # 8 unique chars
VOCAB_SIZE = len(VOCAB)                     # 8
EMBEDDING_DIM = 16
CHAR_TO_IDX = {ch: i for i, ch in enumerate(VOCAB)}

LANE = 128                                  # TPU lane width (minor dim)
SUBLANE = 8                                 # TPU sublane width (2nd-to-minor)
V_PAD = LANE                                # vocab padded to one full lane dim


def tiny_transformer_kernel(idx_ref, emb_ref, w_ref, b_ref, out_ref):
    """idx_ref : (S_pad, 1)     int32 VMEM  token ids (padding rows = -1)
       emb_ref : (V, E)         f32   VMEM  embedding table
       w_ref   : (E, V_PAD)     f32   VMEM  fc weight, pre-transposed, lane-dense
       b_ref   : (1, V_PAD)     f32   VMEM  fc bias, lanes 0-padded
       out_ref : (S_pad, V_PAD) f32   VMEM  padded logits
    """
    # Fold embedding + linear once:  fused[v, :] = emb[v, :] @ W + b.
    # One tiny MXU op, independent of sequence length; stays vreg-resident.
    fused = lax.dot_general(
        emb_ref[...], w_ref[...],
        dimension_numbers=(((1,), (0,)), ((), ())),   # (V, E) x (E, V_PAD)
        preferred_element_type=jnp.float32,
    ) + b_ref[...]                                    # (V, V_PAD); pad lanes stay 0

    # One-hot selection matrix: sel[s, v] = (idx[s] == v).  Single VPU compare;
    # padding rows (id = -1) match nothing -> their logits row is exactly zero.
    s_pad = out_ref.shape[0]
    vocab_iota = lax.broadcasted_iota(jnp.int32, (s_pad, VOCAB_SIZE), 1)
    sel = (idx_ref[...] == vocab_iota).astype(jnp.float32)        # (S_pad, V)

    # Embedding lookup + projection == sel @ fused: one MXU push, one dense
    # unmasked (8, 128) store.
    out_ref[...] = lax.dot_general(
        sel, fused,
        dimension_numbers=(((1,), (0,)), ((), ())),
        preferred_element_type=jnp.float32,
    )


def prepare_params(emb_table, fc_weight, fc_bias):
    """One-time parameter prep, hoisted out of the per-call forward path:
    transpose the torch-layout (V, E) fc weight to lane-dense (E, V_PAD) and
    pad the bias to (1, V_PAD)."""
    w_pad = jnp.zeros((EMBEDDING_DIM, V_PAD), jnp.float32).at[:, :VOCAB_SIZE].set(
        fc_weight.astype(jnp.float32).T)
    b_pad = jnp.zeros((1, V_PAD), jnp.float32).at[0, :VOCAB_SIZE].set(
        fc_bias.astype(jnp.float32))
    return emb_table.astype(jnp.float32), w_pad, b_pad


def tiny_transformer(x_idx, emb_f32, w_pad, b_pad):
    """x_idx: (S,) int token ids; (emb_f32, w_pad, b_pad) from prepare_params().
    Returns logits (S, VOCAB_SIZE) float32."""
    seq = x_idx.shape[0]
    seq_pad = max(SUBLANE, pl.cdiv(seq, SUBLANE) * SUBLANE)

    # Clamp out-of-range ids (nn.Embedding would raise; here they map into the
    # valid range — documented divergence).  Padding rows get id -1 so their
    # one-hot row, and thus their logits row, is all zeros.
    idx = jnp.clip(x_idx.astype(jnp.int32), 0, VOCAB_SIZE - 1)
    idx_pad = jnp.full((seq_pad, 1), -1, dtype=jnp.int32).at[:seq, 0].set(idx)

    out_pad = pl.pallas_call(
        tiny_transformer_kernel,
        out_shape=jax.ShapeDtypeStruct((seq_pad, V_PAD), jnp.float32),
        in_specs=[
            pl.BlockSpec(memory_space=pltpu.MemorySpace.VMEM),   # token ids
            pl.BlockSpec(memory_space=pltpu.MemorySpace.VMEM),   # embedding table
            pl.BlockSpec(memory_space=pltpu.MemorySpace.VMEM),   # fc weight (E, V_PAD)
            pl.BlockSpec(memory_space=pltpu.MemorySpace.VMEM),   # fc bias (1, V_PAD)
        ],
        out_specs=pl.BlockSpec(memory_space=pltpu.MemorySpace.VMEM),
    )(idx_pad, emb_f32, w_pad, b_pad)

    # Strip sublane/lane padding.
    # TODO(synk): for realistic workloads, batch many sequences and add an
    # S-tile grid with dimension_semantics=("parallel",) so v7x's 2 TensorCores
    # share the work, re-deriving tile sizes for its 64 MiB VMEM; pointless at S=4.
    return out_pad[:seq, :VOCAB_SIZE]


if __name__ == "__main__":
    # deterministic parameter init (synthetic; mirrors nn.Embedding / nn.Linear shapes)
    key = jax.random.PRNGKey(0)
    k_emb, k_w, k_b = jax.random.split(key, 3)
    emb_table = jax.random.normal(k_emb, (VOCAB_SIZE, EMBEDDING_DIM), dtype=jnp.float32)
    fc_weight = jax.random.normal(k_w, (VOCAB_SIZE, EMBEDDING_DIM), dtype=jnp.float32) * 0.1
    fc_bias = jax.random.normal(k_b, (VOCAB_SIZE,), dtype=jnp.float32) * 0.1

    # input: encoded 'hello'[:-1] -> 4 token indices, as in the PyTorch script
    corpus = "hello"
    encoded = jnp.array([CHAR_TO_IDX[c] for c in corpus], dtype=jnp.int32)
    x = encoded[:-1]                        # (4,)

    # One-time weight prep (hoisted out of the hot path), then the kernel call.
    emb_f32, w_pad, b_pad = prepare_params(emb_table, fc_weight, fc_bias)
    out = tiny_transformer(x, emb_f32, w_pad, b_pad)
    out = jax.block_until_ready(out)

    # sanity check against a pure-JAX reference of the original forward pass
    ref = emb_table[x] @ fc_weight.T + fc_bias
    assert out.shape == (x.shape[0], VOCAB_SIZE)
    assert jnp.allclose(out, ref, atol=1e-5, rtol=1e-5)

    print("KERNEL_OK")
</pallas_src>

<mosaic_0001>
module attributes {stable_mosaic.version = 11 : i64} {
  func.func @tiny_transformer_kernel(%arg0: memref<8x1xi32, #tpu.memory_space<vmem>>, %arg1: memref<8x16xf32, #tpu.memory_space<vmem>>, %arg2: memref<16x128xf32, #tpu.memory_space<vmem>>, %arg3: memref<1x128xf32, #tpu.memory_space<vmem>>, %arg4: memref<8x128xf32, #tpu.memory_space<vmem>>) attributes {dimension_semantics = [], scalar_prefetch = 0 : i64, scratch_operands = 0 : i64, tpu.core_type = #tpu.core_type<tc>} {
    %c0 = arith.constant 0 : index
    %c0_0 = arith.constant 0 : index
    %0 = vector.load %arg1[%c0, %c0_0] : memref<8x16xf32, #tpu.memory_space<vmem>>, vector<8x16xf32>
    %c0_1 = arith.constant 0 : index
    %c0_2 = arith.constant 0 : index
    %1 = vector.load %arg2[%c0_1, %c0_2] : memref<16x128xf32, #tpu.memory_space<vmem>>, vector<16x128xf32>
    %cst = arith.constant dense<0.000000e+00> : vector<8x128xf32>
    %2 = tpu.matmul %0, %1, %cst {dimension_numbers = #tpu.dot_dimension_numbers<[1], [0], [0], [1], [0, 0, 1, 1], [], []>} : vector<8x16xf32>, vector<16x128xf32>, vector<8x128xf32> -> vector<8x128xf32>
    %c0_3 = arith.constant 0 : index
    %c0_4 = arith.constant 0 : index
    %3 = vector.load %arg3[%c0_3, %c0_4] : memref<1x128xf32, #tpu.memory_space<vmem>>, vector<1x128xf32>
    %4 = vector.broadcast %3 : vector<1x128xf32> to vector<8x128xf32>
    %5 = arith.addf %2, %4 : vector<8x128xf32>
    %6 = tpu.iota {dimensions = array<i32: 1>} : vector<8x8xi32>
    %c0_5 = arith.constant 0 : index
    %c0_6 = arith.constant 0 : index
    %7 = vector.load %arg0[%c0_5, %c0_6] : memref<8x1xi32, #tpu.memory_space<vmem>>, vector<8x1xi32>
    %8 = vector.broadcast %7 : vector<8x1xi32> to vector<8x8xi32>
    %9 = arith.cmpi eq, %8, %6 : vector<8x8xi32>
    %10 = arith.extui %9 : vector<8x8xi1> to vector<8x8xi32>
    %11 = arith.sitofp %10 : vector<8x8xi32> to vector<8x8xf32>
    %cst_7 = arith.constant dense<0.000000e+00> : vector<8x128xf32>
    %12 = tpu.matmul %11, %5, %cst_7 {dimension_numbers = #tpu.dot_dimension_numbers<[1], [0], [0], [1], [0, 0, 1, 1], [], []>} : vector<8x8xf32>, vector<8x128xf32>, vector<8x128xf32> -> vector<8x128xf32>
    %c0_8 = arith.constant 0 : index
    %c0_9 = arith.constant 0 : index
    %13 = vector.load %arg4[%c0_8, %c0_9] : memref<8x128xf32, #tpu.memory_space<vmem>>, vector<8x128xf32>
    tpu.vector_store %arg4[%c0_8, %c0_9], %12 {strides = array<i32>} : memref<8x128xf32, #tpu.memory_space<vmem>>, vector<8x128xf32>,
    return
  }
}

</mosaic_0001>

<bundles_post_ra>
// kernel: tpu_custom_call.1
= control target key start
LH: loop header
LB: loop body
LE: loop exit
PB: predicated region body
PF: predicated region fallthrough
CT: control target
= control target key end

     0   :  { %9 = vsyncpa [#allocation3], 0  ;;  %s225_s0 = inlined_call_operand.vmem [shape: s32[8,1], index: 0, kind: input, shape index: {}]   ;;  %s226_s1 = inlined_call_operand.vmem [shape: f32[8,16], index: 1, kind: input, shape index: {}]   ;;  %s227_s2 = inlined_call_operand.hbm [shape: f32[16,128], index: 2, kind: input, shape index: {}]   ;;  %s228_s3 = inlined_call_operand.vmem [shape: f32[1,128], index: 3, kind: input, shape index: {}]   ;;  %s229_s4 = inlined_call_operand.hbm [shape: f32[8,128], index: 4, kind: output, shape index: {}]  }
   0x1   :  { %10 = vsyncpa [#allocation4], 0  ;;  %s19_s17 = sshll.u32 %s227_s2, 4  ;;  %s179_s18 = smov [#allocation2]   ;;  %s20_s17 = int_to_ptr.hbm [resolvable:$true] %s19_s17 }
   0x2   :  { %s21_s19 = sshll.u32 %s179_s18, 4  ;;  %s180_s20 = smov 128   ;;  %s22_s19 = int_to_ptr.vmem [resolvable:$true] %s21_s19 }
   0x3   :  { %s181_s21 = smov 8  }
   0x4   :  { %27 = dma.hbm_to_vmem [thread:$0]  %s20_s17, 256, %s22_s19, [#allocation3], %s180_s20, %s180_s20, %s181_s21  }
   0x5   :  { %175 = dma.done.wait [#allocation3], 256  }
   0x6   :  { %176 = vsyncadd [#allocation3], 4294967040  ;;  %v182_v0 = vmov 0   ;;  %v36_v1 = vld [vmem:[#allocation2 + $0x8] sm:$0xff]  ;;  %v35_v2 = vld [vmem:[#allocation2] sm:$0xff]  ;;  %vm41_vm0 = vcmask 130048   ;;  %v65_v5 = vlaneseq }
   0x7   :  { %125 = vset.pattern.permute.xlu0 %v182_v0  ;;  %59 = vmatpush.msra.mxu0 %v36_v1  ;;  %v34_v3 = vld [vmem:[%s226_s1] sm:$0xff]  ;;  %v183_v10 = vmov 0.0   ;;  %vm74_vm2 = vcmask 64512   ;;  %s184_s1 = smov [#allocation5]   ;;  %s106_s29 = sshll.u32 %s229_s4, 4  ;;  %s107_s29 = int_to_ptr.hbm [resolvable:$true] %s106_s29 }
   0x8   :  { %v67_v4 = vld [vmem:[%s225_s0] sm:$0xff]  ;;  %v66_v6 = vand.u32 127, %v65_v5  ;;  %s104_s0 = sshll.u32 %s184_s1, 4  ;;  %s105_s0 = int_to_ptr.vmem [resolvable:$true] %s104_s0 }
   0x9   :  { %69 = vperm.xlu0 %125, %v67_v4   ;;  %60 = vmatpush.msra.mxu0 %v35_v2  ;;  %v126_v8 = vld [vmem:[%s228_s3] ss:$0 sm:$0xff] }
   0xa   :  { %116 = vmatmul.msk.f32.vlgmr.msra.gmra.mxu0 %vm41_vm0, %v34_v3 }
  0x7b   :  { %v70_v7 = vpop.permute.xlu0 %69 }
  0x7c   :  { %vm71_vm1 = vcmp.eq.s32.totalorder %v70_v7, %v66_v6 }
  0x7d   :  { %v117_v11 = vsel %vm71_vm1, 1.0, %v183_v10 }
  0x87   :  { %v62_v9 = vpop.f32.mrf.mxu0 }
  0x88   :  { %v63_v12 = vadd.f32 %v126_v8, %v62_v9 }
  0x8a   :  { %93 = vmatpush.msra.mxu1 %v63_v12 }
  0x8b   :  { %118 = vmatmul.msk.f32.vlgmr.msra.gmra.mxu1 %vm74_vm2, %v117_v11 }
 0x108   :  { %v95_v13 = vpop.f32.mrf.mxu1 }
 0x109   :  { %98 = vst [vmem:[#allocation5] sm:$0xff] %v95_v13 }
 0x10a   :  { %109 = dma.vmem_to_hbm [thread:$0]  %s105_s0, 128, %s107_s29, [#allocation4]  }
 0x10b   :  { %177 = dma.done.wait [#allocation4], 128  }
 0x10c   :  { %178 = vsyncadd [#allocation4], 4294967168 }
 0x10d   :  { %114 = vsyncpa [#allocation3], 1 }
 0x10e   :  { %115 = vsyncpa [#allocation4], 1 }

</bundles_post_ra>
